<compile_context>
chip_gen: v6e
topology: v6e:2x2x1
jax: 0.10.0
libtpu: 0.0.40
codegen_flags: <defaults>
</compile_context>

<pallas_src>
import functools

import jax
import jax.numpy as jnp
from jax import lax
from jax.experimental import pallas as pl
from jax.experimental.pallas import tpu as pltpu


def make_skconv_kernel(B, H, Wp, Cin, Cout, M, D):
    BH = B * H
    WpCout = Wp * Cout

    def kernel(lhs_ref, w_ref, bnb_ref, pool_ref, rwfc_ref, fcb_ref,
               fcsw_ref, fcsb_ref, expand_ref, out_ref):
        # lhs_ref:    (M, BH, 3*Wp*Cin)    bf16  pre-shifted per-branch conv LHS
        # w_ref:      (M, 3*Wp*Cin, WpCout) bf16 per-branch conv weight (BN scale folded)
        # bnb_ref:    (M, 1, WpCout)       f32  BN bias, width-packed
        # pool_ref:   (B, BH)              f32  per-batch mean rows (1/(H*Wp))
        # rwfc_ref:   (WpCout, D)          f32  width-reduction x fc weight (BN folded)
        # fcb_ref:    (1, D)               f32  fc BN bias
        # fcsw_ref:   (D, M*WpCout)        f32  fcs weights pre-tiled to packed lanes
        # fcsb_ref:   (1, M*WpCout)        f32  fcs bias pre-tiled
        # expand_ref: (BH, B)              f32  per-batch one-hot row expansion
        # out_ref:    (BH, WpCout)         f32  lane-dense packed output

        # ---- per-branch dilated (3,1) conv: one bf16 MXU matmul per branch,
        #      f32 accumulation, BN bias + ReLU fused ----
        feats = []
        for m in range(M):
            acc = jnp.dot(lhs_ref[m], w_ref[m],
                          preferred_element_type=jnp.float32)       # (BH, WpCout)
            feats.append(jnp.maximum(acc + bnb_ref[m], 0.0))

        # ---- feats_U = sum over branches ----
        feats_u = feats[0]
        for m in range(1, M):
            feats_u = feats_u + feats[m]

        # ---- global average pool over H (matmul on the idle MXU); the width
        #      reduction + fc 1x1 conv (BN scale folded) are one fused weight ----
        gap = jnp.dot(pool_ref[...], feats_u,
                      preferred_element_type=jnp.float32)            # (B, WpCout)
        z = jnp.maximum(
            jnp.dot(gap, rwfc_ref[...], preferred_element_type=jnp.float32)
            + fcb_ref[...], 0.0)                                     # (B, D)

        # ---- per-branch attention logits, already tiled to the packed lanes ----
        logits = (jnp.dot(z, fcsw_ref[...], preferred_element_type=jnp.float32)
                  + fcsb_ref[...])                                   # (B, M*WpCout)

        # ---- softmax over branches on full 128-lane slices ----
        mx = logits[:, :WpCout]
        for m in range(1, M):
            mx = jnp.maximum(mx, logits[:, m * WpCout:(m + 1) * WpCout])
        exps = [jnp.exp(logits[:, m * WpCout:(m + 1) * WpCout] - mx)
                for m in range(M)]
        denom = exps[0]
        for m in range(1, M):
            denom = denom + exps[m]
        inv = pl.reciprocal(denom, approx=True)
        att = jnp.concatenate([e * inv for e in exps], axis=1)       # (B, M*WpCout)

        # ---- broadcast attention to all rows via a tiny matmul ----
        att_full = jnp.dot(expand_ref[...], att,
                           preferred_element_type=jnp.float32)       # (BH, M*WpCout)

        # ---- attention-weighted sum of branch features, full-width store ----
        out = feats[0] * att_full[:, :WpCout]
        for m in range(1, M):
            out = out + feats[m] * att_full[:, m * WpCout:(m + 1) * WpCout]
        out_ref[...] = out

    return kernel


def pack_skconv_params(raw, *, B, H, W, Cin, M, features, d):
    """Build the kernel-ready (packed / folded / bf16) parameter set."""
    Cout = features
    Wp = W + 2
    WpCin, WpCout = Wp * Cin, Wp * Cout
    f32 = jnp.float32

    wconv_k = raw["wconv_k"]            # (M, 3, Cin, Cout)
    bn_scale = raw["bn_scale"]          # (M, Cout)
    bn_bias = raw["bn_bias"]            # (M, Cout)

    # Per-branch conv weight: only the 3 taps each branch uses (no zero blocks),
    # per-width block diagonal so the matmul output is lane-packed, BN scale folded.
    eye_w = jnp.eye(Wp, dtype=f32)
    w_list = []
    for m in range(M):
        blocks = []
        for kh in range(3):
            tap = wconv_k[m, kh] * bn_scale[m][None, :]     # (Cin, Cout)
            blocks.append(jnp.kron(eye_w, tap))             # (WpCin, WpCout)
        w_list.append(jnp.concatenate(blocks, axis=0))      # (3*WpCin, WpCout)
    w_branch = jnp.stack(w_list).astype(jnp.bfloat16)        # (M, 3*WpCin, WpCout)

    bn_bias_p = jnp.stack(
        [jnp.tile(bn_bias[m], Wp) for m in range(M)])[:, None, :]   # (M,1,WpCout)

    pool_rows = jnp.kron(jnp.eye(B, dtype=f32),
                         jnp.full((1, H), 1.0 / (H * Wp), f32))      # (B, B*H)
    expand_rows = jnp.kron(jnp.eye(B, dtype=f32),
                           jnp.ones((H, 1), f32))                    # (B*H, B)

    # Fold width-group reduction into the (BN-scale-folded) fc weight.
    r_w = jnp.tile(jnp.eye(Cout, dtype=f32), (Wp, 1))                # (WpCout, Cout)
    fc_w_s = raw["fc_w_k"] * raw["fc_scale"]                         # (Cout, D)
    rw_fcw = jnp.dot(r_w, fc_w_s)                                    # (WpCout, D)

    # Fold the channel->packed-lane tiling into the fcs weights / bias.
    fcs_w_tiled = jnp.concatenate(
        [jnp.tile(raw["fcs_w_k"][m], (1, Wp)) for m in range(M)], axis=1)  # (D, M*WpCout)
    fcs_b_tiled = jnp.concatenate(
        [jnp.tile(raw["fcs_b"][m], Wp) for m in range(M)])[None, :]        # (1, M*WpCout)

    return {
        "w_branch": w_branch,
        "bn_bias_p": bn_bias_p,
        "pool_rows": pool_rows,
        "rw_fcw": rw_fcw,
        "fc_bias": raw["fc_bias"],        # (1, D)
        "fcs_w_tiled": fcs_w_tiled,
        "fcs_b_tiled": fcs_b_tiled,
        "expand_rows": expand_rows,
    }


def skconv_forward(x_nchw, kp, *, M, features, d):
    B, Cin, H, W = x_nchw.shape
    Cout = features
    Wp = W + 2
    BH = B * H
    WpCin, WpCout = Wp * Cin, Wp * Cout

    # NCHW -> NHWC, zero-pad (height by M, width by 1).  The per-branch conv LHS
    # (3 row-shifted, lane-concatenated slices per branch) is pre-built here so
    # the kernel starts straight with an aligned bf16 matmul.  Pure XLA glue.
    x = jnp.transpose(x_nchw, (0, 2, 3, 1)).astype(jnp.float32)
    xpad = jnp.pad(x, ((0, 0), (M, M), (1, 1), (0, 0)))              # (B, H+2M, Wp, Cin)
    lhs_list = []
    for m in range(M):
        dil = 1 + m
        taps = []
        for kh in range(3):
            u = M + (kh - 1) * dil                                   # padded row offset
            taps.append(xpad[:, u:u + H].reshape(BH, WpCin))
        lhs_list.append(jnp.concatenate(taps, axis=1))               # (BH, 3*WpCin)
    lhs = jnp.stack(lhs_list).astype(jnp.bfloat16)                   # (M, BH, 3*WpCin)

    kernel = make_skconv_kernel(B, H, Wp, Cin, Cout, M, d)

    operands = (lhs, kp["w_branch"], kp["bn_bias_p"], kp["pool_rows"],
                kp["rw_fcw"], kp["fc_bias"], kp["fcs_w_tiled"],
                kp["fcs_b_tiled"], kp["expand_rows"])

    flops = (2 * M * BH * (3 * WpCin) * WpCout      # per-branch conv matmuls
             + 2 * B * BH * WpCout                   # pooling matmul
             + 2 * B * WpCout * d                    # fused rw+fc matmul
             + 2 * B * d * M * WpCout                # fcs matmul (pre-tiled)
             + 2 * BH * B * M * WpCout               # attention row expansion
             + 8 * BH * M * WpCout)                  # elementwise tail
    transcendentals = B * M * WpCout
    bytes_accessed = (sum(int(o.size) * o.dtype.itemsize for o in operands)
                      + BH * WpCout * 4)

    vmem = pl.BlockSpec(memory_space=pltpu.MemorySpace.VMEM)
    out_packed = pl.pallas_call(
        kernel,
        out_shape=jax.ShapeDtypeStruct((BH, WpCout), jnp.float32),
        in_specs=[vmem] * len(operands),
        out_specs=vmem,
        cost_estimate=pl.CostEstimate(flops=flops,
                                      transcendentals=transcendentals,
                                      bytes_accessed=bytes_accessed),
    )(*operands)

    out = out_packed.reshape(B, H, Wp, Cout)
    return jnp.transpose(out, (0, 3, 1, 2))                          # NCHW


def skconv_reference(x, params, *, M, G=1):
    """Pure-JAX (lax.conv) reference replicating the PyTorch forward."""
    feats = []
    for m in range(M):
        dil = 1 + m
        y = lax.conv_general_dilated(
            x, params["wconv_t"][m], window_strides=(1, 1),
            padding=((dil, dil), (1, 1)), rhs_dilation=(dil, 1),
            dimension_numbers=("NCHW", "OIHW", "NCHW"),
            feature_group_count=G)
        y = (y * params["bn_scale"][m][None, :, None, None]
             + params["bn_bias"][m][None, :, None, None])
        feats.append(jnp.maximum(y, 0.0))
    feats_U = sum(feats)
    s = jnp.mean(feats_U, axis=(2, 3), keepdims=True)               # (B,C,1,1)
    z = jnp.einsum("bchw,cd->bdhw", s, params["fc_w_k"])
    z = (z * params["fc_scale"][0][None, :, None, None]
         + params["fc_bias"][0][None, :, None, None])
    z = jnp.maximum(z, 0.0)
    logits = [jnp.einsum("bdhw,dc->bchw", z, params["fcs_w_k"][m])
              + params["fcs_b"][m][None, :, None, None] for m in range(M)]
    att = jax.nn.softmax(jnp.stack(logits, axis=1), axis=1)
    return sum(feats[m] * att[:, m] for m in range(M))


if __name__ == "__main__":
    # SKConv(infeatures=16, features=16, M=2, G=1, r=2, stride=1, L=32)
    B, Cin, H, W = 2, 16, 8, 6
    features, M, G, r, stride, L = 16, 2, 1, 2, 1, 32
    d = features // r
    eps = 1e-5

    key = jax.random.PRNGKey(0)
    ks = jax.random.split(key, 13)

    # Branch conv weights (PyTorch layout: (Cout, Cin/G, 3, 1), G=1, bias=False)
    wconv_t = 0.2 * jax.random.normal(ks[0], (M, features, Cin, 3, 1), jnp.float32)
    gamma = 1.0 + 0.1 * jax.random.normal(ks[1], (M, features), jnp.float32)
    beta = 0.1 * jax.random.normal(ks[2], (M, features), jnp.float32)
    rmean = 0.1 * jax.random.normal(ks[3], (M, features), jnp.float32)
    rvar = 0.8 + 0.4 * jax.random.uniform(ks[4], (M, features), jnp.float32)
    bn_scale = gamma / jnp.sqrt(rvar + eps)
    bn_bias = beta - rmean * bn_scale

    # fc: 1x1 conv features->d (bias=False) + BN(d)
    fc_w_t = 0.2 * jax.random.normal(ks[5], (d, features), jnp.float32)
    fgamma = 1.0 + 0.1 * jax.random.normal(ks[6], (d,), jnp.float32)
    fbeta = 0.1 * jax.random.normal(ks[7], (d,), jnp.float32)
    fmean = 0.1 * jax.random.normal(ks[8], (d,), jnp.float32)
    fvar = 0.8 + 0.4 * jax.random.uniform(ks[9], (d,), jnp.float32)
    fscale = fgamma / jnp.sqrt(fvar + eps)
    fc_scale = fscale[None, :]
    fc_bias = (fbeta - fmean * fscale)[None, :]

    # fcs: M 1x1 convs d->features (with bias)
    fcs_w_t = 0.2 * jax.random.normal(ks[10], (M, features, d), jnp.float32)
    fcs_b = 0.1 * jax.random.normal(ks[11], (M, features), jnp.float32)

    raw = {
        "wconv_t": wconv_t,
        "wconv_k": jnp.transpose(wconv_t[..., 0], (0, 3, 2, 1)),    # (M,3,Cin,Cout)
        "bn_scale": bn_scale, "bn_bias": bn_bias,
        "fc_w_k": jnp.transpose(fc_w_t),                            # (features, d)
        "fc_scale": fc_scale, "fc_bias": fc_bias,
        "fcs_w_k": jnp.transpose(fcs_w_t, (0, 2, 1)),               # (M, d, features)
        "fcs_b": fcs_b,
    }
    kp = pack_skconv_params(raw, B=B, H=H, W=W, Cin=Cin, M=M,
                            features=features, d=d)

    x = jax.random.normal(ks[12], (B, Cin, H, W), jnp.float32)

    fwd = jax.jit(functools.partial(skconv_forward, M=M, features=features, d=d))
    out = jax.block_until_ready(fwd(x, kp))

    ref = skconv_reference(x, raw, M=M, G=G)
    assert out.shape == ref.shape == (B, features, H, W + 2), out.shape
    # Tolerance accounts for bf16 conv operands (f32 accumulation) and the
    # approx-reciprocal branch softmax; f32 everywhere else.
    max_err = float(jnp.max(jnp.abs(out - ref)))
    assert max_err < 5e-2, f"mismatch vs reference: max abs err {max_err}"

    print("KERNEL_OK")
</pallas_src>

<mosaic_0001>
module attributes {stable_mosaic.version = 11 : i64} {
  func.func @kernel(%arg0: memref<2x16x384xbf16, #tpu.memory_space<vmem>>, %arg1: memref<2x384x128xbf16, #tpu.memory_space<vmem>>, %arg2: memref<2x1x128xf32, #tpu.memory_space<vmem>>, %arg3: memref<2x16xf32, #tpu.memory_space<vmem>>, %arg4: memref<128x8xf32, #tpu.memory_space<vmem>>, %arg5: memref<1x8xf32, #tpu.memory_space<vmem>>, %arg6: memref<8x256xf32, #tpu.memory_space<vmem>>, %arg7: memref<1x256xf32, #tpu.memory_space<vmem>>, %arg8: memref<16x2xf32, #tpu.memory_space<vmem>>, %arg9: memref<16x128xf32, #tpu.memory_space<vmem>>) attributes {dimension_semantics = [], scalar_prefetch = 0 : i64, scratch_operands = 0 : i64, tpu.core_type = #tpu.core_type<tc>} {
    %c0 = arith.constant 0 : index
    %c0_0 = arith.constant 0 : index
    %c0_1 = arith.constant 0 : index
    %0 = vector.load %arg0[%c0, %c0_0, %c0_1] : memref<2x16x384xbf16, #tpu.memory_space<vmem>>, vector<1x16x384xbf16>
    %1 = vector.shape_cast %0 : vector<1x16x384xbf16> to vector<16x384xbf16>
    %c0_2 = arith.constant 0 : index
    %c0_3 = arith.constant 0 : index
    %c0_4 = arith.constant 0 : index
    %2 = vector.load %arg1[%c0_2, %c0_3, %c0_4] : memref<2x384x128xbf16, #tpu.memory_space<vmem>>, vector<1x384x128xbf16>
    %3 = vector.shape_cast %2 : vector<1x384x128xbf16> to vector<384x128xbf16>
    %cst = arith.constant dense<0.000000e+00> : vector<16x128xf32>
    %4 = tpu.matmul %1, %3, %cst {dimension_numbers = #tpu.dot_dimension_numbers<[1], [0], [0], [1], [0, 0, 1, 1], [], []>} : vector<16x384xbf16>, vector<384x128xbf16>, vector<16x128xf32> -> vector<16x128xf32>
    %c0_5 = arith.constant 0 : index
    %c0_6 = arith.constant 0 : index
    %c0_7 = arith.constant 0 : index
    %5 = vector.load %arg2[%c0_5, %c0_6, %c0_7] : memref<2x1x128xf32, #tpu.memory_space<vmem>>, vector<1x1x128xf32>
    %6 = vector.shape_cast %5 : vector<1x1x128xf32> to vector<1x128xf32>
    %7 = vector.broadcast %6 : vector<1x128xf32> to vector<16x128xf32>
    %8 = arith.addf %4, %7 : vector<16x128xf32>
    %cst_8 = arith.constant 0.000000e+00 : f32
    %9 = vector.broadcast %cst_8 : f32 to vector<16x128xf32>
    %10 = arith.maximumf %8, %9 : vector<16x128xf32>
    %c1 = arith.constant 1 : index
    %c0_9 = arith.constant 0 : index
    %c0_10 = arith.constant 0 : index
    %11 = vector.load %arg0[%c1, %c0_9, %c0_10] : memref<2x16x384xbf16, #tpu.memory_space<vmem>>, vector<1x16x384xbf16>
    %12 = vector.shape_cast %11 : vector<1x16x384xbf16> to vector<16x384xbf16>
    %c1_11 = arith.constant 1 : index
    %c0_12 = arith.constant 0 : index
    %c0_13 = arith.constant 0 : index
    %13 = vector.load %arg1[%c1_11, %c0_12, %c0_13] : memref<2x384x128xbf16, #tpu.memory_space<vmem>>, vector<1x384x128xbf16>
    %14 = vector.shape_cast %13 : vector<1x384x128xbf16> to vector<384x128xbf16>
    %cst_14 = arith.constant dense<0.000000e+00> : vector<16x128xf32>
    %15 = tpu.matmul %12, %14, %cst_14 {dimension_numbers = #tpu.dot_dimension_numbers<[1], [0], [0], [1], [0, 0, 1, 1], [], []>} : vector<16x384xbf16>, vector<384x128xbf16>, vector<16x128xf32> -> vector<16x128xf32>
    %c1_15 = arith.constant 1 : index
    %c0_16 = arith.constant 0 : index
    %c0_17 = arith.constant 0 : index
    %16 = vector.load %arg2[%c1_15, %c0_16, %c0_17] : memref<2x1x128xf32, #tpu.memory_space<vmem>>, vector<1x1x128xf32>
    %17 = vector.shape_cast %16 : vector<1x1x128xf32> to vector<1x128xf32>
    %18 = vector.broadcast %17 : vector<1x128xf32> to vector<16x128xf32>
    %19 = arith.addf %15, %18 : vector<16x128xf32>
    %cst_18 = arith.constant 0.000000e+00 : f32
    %20 = vector.broadcast %cst_18 : f32 to vector<16x128xf32>
    %21 = arith.maximumf %19, %20 : vector<16x128xf32>
    %22 = arith.addf %10, %21 : vector<16x128xf32>
    %c0_19 = arith.constant 0 : index
    %c0_20 = arith.constant 0 : index
    %23 = vector.load %arg3[%c0_19, %c0_20] : memref<2x16xf32, #tpu.memory_space<vmem>>, vector<2x16xf32>
    %cst_21 = arith.constant dense<0.000000e+00> : vector<2x128xf32>
    %24 = tpu.matmul %23, %22, %cst_21 {dimension_numbers = #tpu.dot_dimension_numbers<[1], [0], [0], [1], [0, 0, 1, 1], [], []>} : vector<2x16xf32>, vector<16x128xf32>, vector<2x128xf32> -> vector<2x128xf32>
    %c0_22 = arith.constant 0 : index
    %c0_23 = arith.constant 0 : index
    %25 = vector.load %arg4[%c0_22, %c0_23] : memref<128x8xf32, #tpu.memory_space<vmem>>, vector<128x8xf32>
    %cst_24 = arith.constant dense<0.000000e+00> : vector<2x8xf32>
    %26 = tpu.matmul %24, %25, %cst_24 {dimension_numbers = #tpu.dot_dimension_numbers<[1], [0], [0], [1], [0, 0, 1, 1], [], []>} : vector<2x128xf32>, vector<128x8xf32>, vector<2x8xf32> -> vector<2x8xf32>
    %c0_25 = arith.constant 0 : index
    %c0_26 = arith.constant 0 : index
    %27 = vector.load %arg5[%c0_25, %c0_26] : memref<1x8xf32, #tpu.memory_space<vmem>>, vector<1x8xf32>
    %28 = vector.broadcast %27 : vector<1x8xf32> to vector<2x8xf32>
    %29 = arith.addf %26, %28 : vector<2x8xf32>
    %cst_27 = arith.constant 0.000000e+00 : f32
    %30 = vector.broadcast %cst_27 : f32 to vector<2x8xf32>
    %31 = arith.maximumf %29, %30 : vector<2x8xf32>
    %c0_28 = arith.constant 0 : index
    %c0_29 = arith.constant 0 : index
    %32 = vector.load %arg6[%c0_28, %c0_29] : memref<8x256xf32, #tpu.memory_space<vmem>>, vector<8x256xf32>
    %cst_30 = arith.constant dense<0.000000e+00> : vector<2x256xf32>
    %33 = tpu.matmul %31, %32, %cst_30 {dimension_numbers = #tpu.dot_dimension_numbers<[1], [0], [0], [1], [0, 0, 1, 1], [], []>} : vector<2x8xf32>, vector<8x256xf32>, vector<2x256xf32> -> vector<2x256xf32>
    %c0_31 = arith.constant 0 : index
    %c0_32 = arith.constant 0 : index
    %34 = vector.load %arg7[%c0_31, %c0_32] : memref<1x256xf32, #tpu.memory_space<vmem>>, vector<1x256xf32>
    %35 = vector.broadcast %34 : vector<1x256xf32> to vector<2x256xf32>
    %36 = arith.addf %33, %35 : vector<2x256xf32>
    %37 = vector.extract_strided_slice %36 {offsets = [0, 0], sizes = [2, 128], strides = [1, 1]} : vector<2x256xf32> to vector<2x128xf32>
    %38 = vector.extract_strided_slice %36 {offsets = [0, 128], sizes = [2, 128], strides = [1, 1]} : vector<2x256xf32> to vector<2x128xf32>
    %39 = arith.maximumf %37, %38 : vector<2x128xf32>
    %40 = vector.extract_strided_slice %36 {offsets = [0, 0], sizes = [2, 128], strides = [1, 1]} : vector<2x256xf32> to vector<2x128xf32>
    %41 = arith.subf %40, %39 : vector<2x128xf32>
    %42 = math.exp %41 : vector<2x128xf32>
    %43 = vector.extract_strided_slice %36 {offsets = [0, 128], sizes = [2, 128], strides = [1, 1]} : vector<2x256xf32> to vector<2x128xf32>
    %44 = arith.subf %43, %39 : vector<2x128xf32>
    %45 = math.exp %44 : vector<2x128xf32>
    %46 = arith.addf %42, %45 : vector<2x128xf32>
    %47 = tpu.reciprocal %46 {approx = true} : vector<2x128xf32> -> vector<2x128xf32>
    %48 = arith.mulf %42, %47 : vector<2x128xf32>
    %49 = arith.mulf %45, %47 : vector<2x128xf32>
    %50 = tpu.concatenate %48, %49 in 1 : vector<2x128xf32>, vector<2x128xf32> -> vector<2x256xf32>
    %c0_33 = arith.constant 0 : index
    %c0_34 = arith.constant 0 : index
    %51 = vector.load %arg8[%c0_33, %c0_34] : memref<16x2xf32, #tpu.memory_space<vmem>>, vector<16x2xf32>
    %cst_35 = arith.constant dense<0.000000e+00> : vector<16x256xf32>
    %52 = tpu.matmul %51, %50, %cst_35 {dimension_numbers = #tpu.dot_dimension_numbers<[1], [0], [0], [1], [0, 0, 1, 1], [], []>} : vector<16x2xf32>, vector<2x256xf32>, vector<16x256xf32> -> vector<16x256xf32>
    %53 = vector.extract_strided_slice %52 {offsets = [0, 0], sizes = [16, 128], strides = [1, 1]} : vector<16x256xf32> to vector<16x128xf32>
    %54 = arith.mulf %10, %53 : vector<16x128xf32>
    %55 = vector.extract_strided_slice %52 {offsets = [0, 128], sizes = [16, 128], strides = [1, 1]} : vector<16x256xf32> to vector<16x128xf32>
    %56 = arith.mulf %21, %55 : vector<16x128xf32>
    %57 = arith.addf %54, %56 : vector<16x128xf32>
    %c0_36 = arith.constant 0 : index
    %c0_37 = arith.constant 0 : index
    %58 = vector.load %arg9[%c0_36, %c0_37] : memref<16x128xf32, #tpu.memory_space<vmem>>, vector<16x128xf32>
    tpu.vector_store %arg9[%c0_36, %c0_37], %57 {strides = array<i32>} : memref<16x128xf32, #tpu.memory_space<vmem>>, vector<16x128xf32>,
    return
  }
}

</mosaic_0001>

<bundles_post_ra>
// kernel: skconv_forward.1
= control target key start
LH: loop header
LB: loop body
LE: loop exit
PB: predicated region body
PF: predicated region fallthrough
CT: control target
= control target key end

     0   :  { %v1362_v1 = vmov 0.0   ;;  %vm1363_vm0 = vmmov 0   ;;  %vm645_vm1 = vcmask 130048   ;;  %vm827_vm2 = vcmask 64512   ;;  %s1730_s1 = inlined_call_operand.vmem [shape: bf16[2,384,128], index: 1, kind: input, shape index: {}]   ;;  %s1731_s0 = inlined_call_operand.vmem [shape: bf16[2,16,384], index: 0, kind: input, shape index: {}]   ;;  %s1732_s4 = inlined_call_operand.vmem [shape: f32[128,8], index: 4, kind: input, shape index: {}]   ;;  %s1733_s2 = inlined_call_operand.vmem [shape: f32[2,1,128], index: 2, kind: input, shape index: {}]   ;;  %s1734_s3 = inlined_call_operand.vmem [shape: f32[2,16], index: 3, kind: input, shape index: {}]   ;;  %s1735_s6 = inlined_call_operand.vmem [shape: f32[8,256], index: 6, kind: input, shape index: {}]   ;;  %s1736_s5 = inlined_call_operand.vmem [shape: f32[1,8], index: 5, kind: input, shape index: {}]   ;;  %s1737_s7 = inlined_call_operand.vmem [shape: f32[1,256], index: 7, kind: input, shape index: {}]   ;;  %s1738_s8 = inlined_call_operand.vmem [shape: f32[16,2], index: 8, kind: input, shape index: {}]   ;;  %s1739_s9 = inlined_call_operand.vmem [shape: f32[16,128], index: 9, kind: output, shape index: {}]  }
   0x1   :  { %v1300_v0 = vld [vmem:[%s1730_s1 + $0x78] sm:$0xff]   ;;  %1216 = vmatprep.subr.bf16.mxu1 %v1362_v1  ;;  %1232 = vmatprep.mubr.msk.bf16.mxu1 %vm1363_vm0, %v1362_v1  ;;  %v1303_v4 = vld [vmem:[%s1730_s1 + $0x70] sm:$0xff]   ;;  %v1306_v7 = vld [vmem:[%s1730_s1 + $0x68] sm:$0xff]   ;;  %vm922_vm3 = vcmask 1041408   ;;  %vm915_vm4 = vcmask 15360  }
   0x2   :  { %v1301_v2 = vld [vmem:[%s1730_s1 + $0x38] sm:$0xff]   ;;  %1134 = vmatprep.subr.bf16.mxu0 %v1300_v0  ;;  %v1304_v5 = vld [vmem:[%s1730_s1 + $0x30] sm:$0xff]   ;;  %v1307_v8 = vld [vmem:[%s1730_s1 + $0x28] sm:$0xff]  }
   0x3   :  { %v1302_v3 = vld [vmem:[%s1730_s1 + $0xb8] sm:$0xff]   ;;  %1135 = vmatpush3.bf16.msra.mxu0 %v1301_v2  ;;  %v1305_v6 = vld [vmem:[%s1730_s1 + $0xb0] sm:$0xff]   ;;  %v1308_v9 = vld [vmem:[%s1730_s1 + $0xa8] sm:$0xff]  }
   0x4   :  { %1217 = vmatpush3.bf16.msra.mxu1 %v1302_v3  ;;  %1136 = vmatprep.subr.bf16.mxu0 %v1303_v4  ;;  %v1309_v10 = vld [vmem:[%s1730_s1 + $0x60] sm:$0xff]   ;;  %v1312_v13 = vld [vmem:[%s1730_s1 + $0x58] sm:$0xff]   ;;  %v1315_v16 = vld [vmem:[%s1730_s1 + $0x50] sm:$0xff]  }
   0x5   :  { %1218 = vmatprep.subr.bf16.mxu1 %v1362_v1  ;;  %v1310_v11 = vld [vmem:[%s1730_s1 + $0x20] sm:$0xff]   ;;  %v1313_v14 = vld [vmem:[%s1730_s1 + $0x18] sm:$0xff]   ;;  %v1316_v17 = vld [vmem:[%s1730_s1 + $0x10] sm:$0xff]  }
   0x6   :  { %v1311_v12 = vld [vmem:[%s1730_s1 + $0xa0] sm:$0xff]   ;;  %v1314_v15 = vld [vmem:[%s1730_s1 + $0x98] sm:$0xff]   ;;  %v1317_v18 = vld [vmem:[%s1730_s1 + $0x90] sm:$0xff]  }
   0x7   :  { %1137 = vmatpush3.bf16.msra.mxu0 %v1304_v5  ;;  %v1318_v19 = vld [vmem:[%s1730_s1 + $0x48] sm:$0xff]   ;;  %v1321_v22 = vld [vmem:[%s1730_s1 + $0x40] sm:$0xff]   ;;  %v1327_v27 = vld [vmem:[%s1730_s1 + $0x138] sm:$0xff]  }
   0x8   :  { %1219 = vmatpush3.bf16.msra.mxu1 %v1305_v6  ;;  %1138 = vmatprep.subr.bf16.mxu0 %v1306_v7  ;;  %v1319_v20 = vld [vmem:[%s1730_s1 + $0x8] sm:$0xff]   ;;  %v1326_v23 = vld [vmem:[%s1731_s0 + $0x4] ss:$12 sps:$4 sm:$0xff]   ;;  %v1329_v29 = vld [vmem:[%s1730_s1 + $0xf8] sm:$0xff]  }
   0x9   :  { %1220 = vmatprep.subr.bf16.mxu1 %v1362_v1  ;;  %v1320_v21 = vld [vmem:[%s1730_s1 + $0x88] sm:$0xff]   ;;  %v1322_v24 = vld [vmem:[%s1730_s1] sm:$0xff]   ;;  %284 = vmatprep.mubr.bf16.mxu0 %v1326_v23  ;;  %v1330_v30 = vld [vmem:[%s1730_s1 + $0x178] sm:$0xff]  }
   0xa   :  { %v1323_v25 = vld [vmem:[%s1730_s1 + $0x80] sm:$0xff]   ;;  %v1328_v28 = vld [vmem:[%s1731_s0 + $0x8] ss:$12 sps:$4 sm:$0xff]   ;;  %v1340_v40 = vld [vmem:[%s1730_s1 + $0x118] sm:$0xff]  }
   0xb   :  { %1139 = vmatpush3.bf16.msra.mxu0 %v1307_v8  ;;  %v1324_v26 = vld [vmem:[%s1731_s0] ss:$12 sps:$4 sm:$0xff]   ;;  %v1331_v31 = vld [vmem:[%s1730_s1 + $0x130] sm:$0xff]   ;;  %v1341_v41 = vld [vmem:[%s1730_s1 + $0xd8] sm:$0xff]  }
   0xc   :  { %1221 = vmatpush3.bf16.msra.mxu1 %v1308_v9  ;;  %1140 = vmatprep.subr.bf16.mxu0 %v1309_v10  ;;  %v1332_v32 = vld [vmem:[%s1730_s1 + $0xf0] sm:$0xff]   ;;  %v1334_v34 = vld [vmem:[%s1730_s1 + $0x128] sm:$0xff]   ;;  %v1337_v37 = vld [vmem:[%s1730_s1 + $0x120] sm:$0xff]  }
   0xd   :  { %1222 = vmatprep.subr.bf16.mxu1 %v1362_v1  ;;  %v1333_v33 = vld [vmem:[%s1730_s1 + $0x170] sm:$0xff]   ;;  %v1335_v35 = vld [vmem:[%s1730_s1 + $0xe8] sm:$0xff]   ;;  %v1338_v38 = vld [vmem:[%s1730_s1 + $0xe0] sm:$0xff]  }
   0xe   :  { %v1336_v36 = vld [vmem:[%s1730_s1 + $0x168] sm:$0xff]   ;;  %v1339_v39 = vld [vmem:[%s1730_s1 + $0x160] sm:$0xff]   ;;  %v1342_v42 = vld [vmem:[%s1730_s1 + $0x158] sm:$0xff]  }
   0xf   :  { %1141 = vmatpush3.bf16.msra.mxu0 %v1310_v11  ;;  %v1343_v43 = vld [vmem:[%s1730_s1 + $0x110] sm:$0xff]   ;;  %v1354_v45 = vld [vmem:[%s1731_s0 + $0x1c] ss:$12 sps:$4 sm:$0xff]   ;;  %v1349_v50 = vld [vmem:[%s1730_s1 + $0x100] sm:$0xff]  }
  0x10   :  { %1223 = vmatpush3.bf16.msra.mxu1 %v1311_v12  ;;  %1142 = vmatprep.subr.bf16.mxu0 %v1312_v13  ;;  %v1344_v44 = vld [vmem:[%s1730_s1 + $0xd0] sm:$0xff]   ;;  %v1346_v47 = vld [vmem:[%s1730_s1 + $0x108] sm:$0xff]   ;;  %v1350_v51 = vld [vmem:[%s1730_s1 + $0xc0] sm:$0xff]  }
  0x11   :  { %1224 = vmatprep.subr.bf16.mxu1 %v1362_v1  ;;  %v1345_v46 = vld [vmem:[%s1730_s1 + $0x150] sm:$0xff]   ;;  %v1347_v48 = vld [vmem:[%s1730_s1 + $0xc8] sm:$0xff]   ;;  %v1351_v52 = vld [vmem:[%s1730_s1 + $0x140] sm:$0xff]  }
  0x12   :  { %v1348_v49 = vld [vmem:[%s1730_s1 + $0x148] sm:$0xff]   ;;  %v1352_v53 = vld [vmem:[%s1731_s0 + $0x18] ss:$12 sps:$4 sm:$0xff]   ;;  %v733_v56 = vld [vmem:[%s1732_s4 + $0x70] sm:$0xff] }
  0x13   :  { %1143 = vmatpush3.bf16.msra.mxu0 %v1313_v14  ;;  %v1355_v54 = vld [vmem:[%s1731_s0 + $0x20] ss:$12 sps:$4 sm:$0xff]   ;;  %v734_v55 = vld [vmem:[%s1732_s4 + $0x78] sm:$0xff]  ;;  %v729_v60 = vld [vmem:[%s1732_s4 + $0x50] sm:$0xff] }
  0x14   :  { %1225 = vmatpush3.bf16.msra.mxu1 %v1314_v15  ;;  %1144 = vmatprep.subr.bf16.mxu0 %v1315_v16  ;;  %v732_v57 = vld [vmem:[%s1732_s4 + $0x68] sm:$0xff]  ;;  %v731_v58 = vld [vmem:[%s1732_s4 + $0x60] sm:$0xff]  ;;  %v730_v59 = vld [vmem:[%s1732_s4 + $0x58] sm:$0xff] }
  0x15   :  { %1226 = vmatprep.subr.bf16.mxu1 %v1362_v1  ;;  %v728_v61 = vld [vmem:[%s1732_s4 + $0x48] sm:$0xff]  ;;  %v727_v62 = vld [vmem:[%s1732_s4 + $0x40] sm:$0xff]  ;;  %v726_v63 = vld [vmem:[%s1732_s4 + $0x38] sm:$0xff] }
  0x16   :  { %v725_v0 = vld [vmem:[%s1732_s4 + $0x30] sm:$0xff]  ;;  %v724_v2 = vld [vmem:[%s1732_s4 + $0x28] sm:$0xff]  ;;  %v723_v3 = vld [vmem:[%s1732_s4 + $0x20] sm:$0xff] }
  0x17   :  { %1145 = vmatpush3.bf16.msra.mxu0 %v1316_v17  ;;  %v722_v4 = vld [vmem:[%s1732_s4 + $0x18] sm:$0xff]  ;;  %v721_v5 = vld [vmem:[%s1732_s4 + $0x10] sm:$0xff]  ;;  %v720_v6 = vld [vmem:[%s1732_s4 + $0x8] sm:$0xff] }
  0x18   :  { %1227 = vmatpush3.bf16.msra.mxu1 %v1317_v18  ;;  %1146 = vmatprep.subr.bf16.mxu0 %v1318_v19  ;;  %v1099_v18 = vld [vmem:[%s1733_s2 + $0x1] ss:$0 sm:$0xff]  ;;  %v1018_v23 = vld [vmem:[%s1733_s2] ss:$0 sm:$0xff] }
  0x19   :  { %1228 = vmatprep.subr.bf16.mxu1 %v1362_v1 }
  0x1b   :  { %1147 = vmatpush3.bf16.msra.mxu0 %v1319_v20 }
  0x1c   :  { %1229 = vmatpush3.bf16.msra.mxu1 %v1320_v21  ;;  %1148 = vmatprep.subr.bf16.mxu0 %v1321_v22 }
  0x1d   :  { %1230 = vmatprep.subr.bf16.mxu1 %v1362_v1 }
  0x1f   :  { %1149 = vmatpush3.bf16.msra.mxu0 %v1322_v24 }
  0x20   :  { %1231 = vmatpush3.bf16.msra.mxu1 %v1323_v25  ;;  %1165 = vmatprep.subr.bf16.mxu0 %v1327_v27 }
  0x21   :  { %1236 = vmatprep.subr.bf16.mxu1 %v1362_v1 }
  0x22   :  { %285 = vmatmul.mubr.bf16.vlgmr.msra.gmra.mxu0 %v1324_v26 }
  0x23   :  { %1233 = vmatmul.mubr.bf16.vlgmr.msra.gmra.mxu1 %v1328_v28  ;;  %1166 = vmatpush3.bf16.msra.mxu0 %v1329_v29 }
  0x24   :  { %1237 = vmatpush3.bf16.msra.mxu1 %v1330_v30  ;;  %1167 = vmatprep.subr.bf16.mxu0 %v1331_v31 }
  0x25   :  { %1238 = vmatprep.subr.bf16.mxu1 %v1362_v1  ;;  %1252 = vmatprep.mubr.msk.bf16.mxu1 %vm1363_vm0, %v1362_v1 }
  0x26   :  { %590 = vmatprep.mubr.bf16.mxu0 %v1354_v45 }
  0x27   :  { %1168 = vmatpush3.bf16.msra.mxu0 %v1332_v32 }
  0x28   :  { %1239 = vmatpush3.bf16.msra.mxu1 %v1333_v33  ;;  %1169 = vmatprep.subr.bf16.mxu0 %v1334_v34 }
  0x29   :  { %1240 = vmatprep.subr.bf16.mxu1 %v1362_v1 }
  0x2b   :  { %1170 = vmatpush3.bf16.msra.mxu0 %v1335_v35 }
  0x2c   :  { %1241 = vmatpush3.bf16.msra.mxu1 %v1336_v36  ;;  %1171 = vmatprep.subr.bf16.mxu0 %v1337_v37 }
  0x2d   :  { %1242 = vmatprep.subr.bf16.mxu1 %v1362_v1 }
  0x2f   :  { %1172 = vmatpush3.bf16.msra.mxu0 %v1338_v38 }
  0x30   :  { %1243 = vmatpush3.bf16.msra.mxu1 %v1339_v39  ;;  %1173 = vmatprep.subr.bf16.mxu0 %v1340_v40 }
  0x31   :  { %1244 = vmatprep.subr.bf16.mxu1 %v1362_v1 }
  0x33   :  { %1174 = vmatpush3.bf16.msra.mxu0 %v1341_v41 }
  0x34   :  { %1245 = vmatpush3.bf16.msra.mxu1 %v1342_v42  ;;  %1175 = vmatprep.subr.bf16.mxu0 %v1343_v43  ;;  %v644_v43 = vld [vmem:[%s1734_s3] sm:$0x3] }
  0x35   :  { %1246 = vmatprep.subr.bf16.mxu1 %v1362_v1 }
  0x37   :  { %1176 = vmatpush3.bf16.msra.mxu0 %v1344_v44  ;;  %v719_v44 = vld [vmem:[%s1732_s4] sm:$0xff] }
  0x38   :  { %1247 = vmatpush3.bf16.msra.mxu1 %v1345_v46  ;;  %1177 = vmatprep.subr.bf16.mxu0 %v1346_v47  ;;  %v814_v47 = vld [vmem:[%s1735_s6 + $0x8] sm:$0xff] }
  0x39   :  { %1248 = vmatprep.subr.bf16.mxu1 %v1362_v1 }
  0x3b   :  { %1178 = vmatpush3.bf16.msra.mxu0 %v1347_v48  ;;  %v813_v48 = vld [vmem:[%s1735_s6] sm:$0xff] }
  0x3c   :  { %1249 = vmatpush3.bf16.msra.mxu1 %v1348_v49  ;;  %1179 = vmatprep.subr.bf16.mxu0 %v1349_v50  ;;  %v1128_v49 = vld [vmem:[%s1736_s5] ss:$0 sm:$0xff] }
  0x3d   :  { %1250 = vmatprep.subr.bf16.mxu1 %v1362_v1 }
  0x3f   :  { %1180 = vmatpush3.bf16.msra.mxu0 %v1350_v51 }
  0x40   :  { %1251 = vmatpush3.bf16.msra.mxu1 %v1351_v52  ;;  %1256 = vmatprep.subr.mxu0 %v1362_v1 }
  0x41   :  { %1263 = vmatprep.subr.mxu1 %v1362_v1 }
  0x42   :  { %591 = vmatmul.mubr.bf16.vlgmr.msra.gmra.mxu0 %v1352_v53 }
  0x43   :  { %1253 = vmatmul.mubr.bf16.vlgmr.msra.gmra.mxu1 %v1355_v54  ;;  %1260 = vmatprep.mubr.msk.f32.mxu0 %vm1363_vm0, %v1362_v1  ;;  %v817_v54 = vlaneseq }
  0x44   :  { %1295 = vmatprep.mubr.msk.f32.mxu1 %vm1363_vm0, %v1362_v1  ;;  %1264 = vmatpush3.msra.mxu1 %v734_v55 }
  0x45   :  { %1265 = vmatprep.subr.mxu1 %v1362_v1  ;;  %v818_v55 = vshrl.u32 %v817_v54, 7 }
  0x46   :  { %1266 = vmatpush3.msra.mxu1 %v733_v56 }
  0x47   :  { %1267 = vmatprep.subr.mxu1 %v1362_v1  ;;  %v819_v56 = vsub.s32 0, %v818_v55 }
  0x48   :  { %1268 = vmatpush3.msra.mxu1 %v732_v57  ;;  %v823_v57 = vsub.s32 1, %v818_v55 }
  0x49   :  { %1269 = vmatprep.subr.mxu1 %v1362_v1 }
  0x4a   :  { %1270 = vmatpush3.msra.mxu1 %v731_v58  ;;  %v815_v58 = vld [vmem:[%s1737_s7] sm:$0x3] }
  0x4b   :  { %1271 = vmatprep.subr.mxu1 %v1362_v1 }
  0x4c   :  { %1272 = vmatpush3.msra.mxu1 %v730_v59  ;;  %v820_v59 = vrot.slane %v815_v58, %v819_v56 }
  0x4d   :  { %1273 = vmatprep.subr.mxu1 %v1362_v1 }
  0x4e   :  { %1274 = vmatpush3.msra.mxu1 %v729_v60  ;;  %v824_v60 = vrot.slane %v815_v58, %v823_v57 }
  0x4f   :  { %1275 = vmatprep.subr.mxu1 %v1362_v1 }
  0x50   :  { %1276 = vmatpush3.msra.mxu1 %v728_v61 }
  0x51   :  { %1277 = vmatprep.subr.mxu1 %v1362_v1 }
  0x52   :  { %1278 = vmatpush3.msra.mxu1 %v727_v62 }
  0x53   :  { %1279 = vmatprep.subr.mxu1 %v1362_v1 }
  0x54   :  { %1280 = vmatpush3.msra.mxu1 %v726_v63 }
  0x55   :  { %1281 = vmatprep.subr.mxu1 %v1362_v1 }
  0x56   :  { %1282 = vmatpush3.msra.mxu1 %v725_v0 }
  0x57   :  { %1283 = vmatprep.subr.mxu1 %v1362_v1 }
  0x58   :  { %1284 = vmatpush3.msra.mxu1 %v724_v2 }
  0x59   :  { %1285 = vmatprep.subr.mxu1 %v1362_v1 }
  0x5a   :  { %1286 = vmatpush3.msra.mxu1 %v723_v3 }
  0x5b   :  { %1287 = vmatprep.subr.mxu1 %v1362_v1 }
  0x5c   :  { %1288 = vmatpush3.msra.mxu1 %v722_v4 }
  0x5d   :  { %1289 = vmatprep.subr.mxu1 %v1362_v1 }
  0x5e   :  { %1290 = vmatpush3.msra.mxu1 %v721_v5 }
  0x5f   :  { %1291 = vmatprep.subr.mxu1 %v1362_v1 }
  0x60   :  { %1292 = vmatpush3.msra.mxu1 %v720_v6 }
  0x61   :  { %1293 = vmatprep.subr.mxu1 %v1362_v1 }
  0x62   :  { %1294 = vmatpush3.msra.mxu1 %v719_v44 }
  0xe2   :  { %v1150_v11 = vpop.f32.mrf.mxu0 }
  0xe3   :  { %v327_v7 = vpop.f32.mrf.mxu1 }
  0xe4   :  { %v1151_v12 = vpop.f32.mrf.mxu0 }
  0xe5   :  { %v1234_v8 = vpop.f32.mrf.mxu1  ;;  %v1152_v20 = vadd.f32 %v1151_v12, %v1150_v11 }
  0xe6   :  { %v1153_v13 = vpop.f32.mrf.mxu0 }
  0xe7   :  { %v330_v9 = vpop.f32.mrf.mxu1  ;;  %v287_v29 = vadd.f32 %v1152_v20, %v1018_v23 }
  0xe8   :  { %v1154_v14 = vpop.f32.mrf.mxu0 }
  0xe9   :  { %v1235_v10 = vpop.f32.mrf.mxu1  ;;  %v1155_v16 = vadd.f32 %v1154_v14, %v1153_v13  ;;  %v1672_v35 = vadd.f32 %v327_v7, %v287_v29  ;;  %v913_v13 = vld [vmem:[%s1738_s8] sm:$0xff]  ;;  %v914_v14 = vld [vmem:[%s1738_s8 + $0x8] sm:$0xff] }
  0xeb   :  { %v290_v25 = vadd.f32 %v1155_v16, %v1018_v23  ;;  %v334_v40 = vmax.f32 %v1672_v35, 0.0 }
  0xed   :  { %v1668_v32 = vadd.f32 %v330_v9, %v290_v25 }
  0xef   :  { %v335_v37 = vmax.f32 %v1668_v32, 0.0 }
 0x102   :  { %v1181_v15 = vpop.f32.mrf.mxu0 }
 0x103   :  { %v633_v17 = vpop.f32.mrf.mxu1 }
 0x104   :  { %v1182_v19 = vpop.f32.mrf.mxu0 }
 0x105   :  { %v1183_v21 = vadd.f32 %v1182_v19, %v1181_v15  ;;  %v1254_v22 = vpop.f32.mrf.mxu1 }
 0x106   :  { %v1184_v24 = vpop.f32.mrf.mxu0 }
 0x107   :  { %v593_v26 = vadd.f32 %v1183_v21, %v1099_v18  ;;  %v636_v27 = vpop.f32.mrf.mxu1 }
 0x108   :  { %v1185_v28 = vpop.f32.mrf.mxu0 }
 0x109   :  { %v1186_v30 = vadd.f32 %v1185_v28, %v1184_v24  ;;  %v1255_v31 = vpop.f32.mrf.mxu1  ;;  %v1670_v33 = vadd.f32 %v633_v17, %v593_v26 }
 0x10b   :  { %v596_v34 = vadd.f32 %v1186_v30, %v1099_v18  ;;  %v640_v38 = vmax.f32 %v1670_v33, 0.0 }
 0x10d   :  { %v1674_v36 = vadd.f32 %v636_v27, %v596_v34  ;;  %v642_v42 = vadd.f32 %v640_v38, %v334_v40 }
 0x10f   :  { %v641_v39 = vmax.f32 %v1674_v36, 0.0 }
 0x111   :  { %v643_v41 = vadd.f32 %v641_v39, %v335_v37 }
 0x113   :  { %1257 = vmatpush3.msra.mxu0 %v643_v41 }
 0x114   :  { %1258 = vmatprep.subr.mxu0 %v1362_v1 }
 0x115   :  { %1259 = vmatpush3.msra.mxu0 %v642_v42 }
 0x116   :  { %1261 = vmatmul.mubr.msk.f32.vlgmr.msra.gmra.mxu0 %vm645_vm1, %v644_v43  ;;  %861 = vmatprep.subr.mxu0 %v814_v47 }
 0x117   :  { %895 = vmatprep.mubr.f32.mxu0 %v1362_v1  ;;  %862 = vmatpush1.msra.mxu0 %v813_v48 }
 0x1d6   :  { %v715_v45 = vpop.f32.mrf.mxu0 }
 0x1d7   :  { %1296 = vmatmul.mubr.f32.vlgmr.msra.gmra.mxu1 %v715_v45 }
 0x1d8   :  { %v1262_v46 = vpop.f32.mrf.mxu0 }
 0x297   :  { %v808_v50 = vpop.f32.mrf.mxu1 }
 0x298   :  { %v809_v51 = vadd.f32 %v1128_v49, %v808_v50 }
 0x299   :  { %v1297_v52 = vpop.f32.mrf.mxu1 }
 0x29a   :  { %v812_v53 = vmax.f32 %v809_v51, 0.0 }
 0x29c   :  { %1129 = vmatmul.mubr.msk.f32.vlgmr.msra.gmra.mxu0 %vm827_vm2, %v812_v53 }
 0x29d   :  { %993 = vmatprep.mubr.f32.mxu0 %v1362_v1 }
 0x35c   :  { %v897_v61 = vpop.f32.mrf.mxu0 }
 0x35d   :  { %v898_v63 = vadd.f32 %v897_v61, %v820_v59 }
 0x35e   :  { %v899_v62 = vpop.f32.mrf.mxu0 }
 0x35f   :  { %v900_v0 = vadd.f32 %v899_v62, %v824_v60 }
 0x361   :  { %v902_v2 = vmax.f32 %v898_v63, %v900_v0 }
 0x363   :  { %v903_v3 = vsub.f32 %v898_v63, %v902_v2  ;;  %v906_v4 = vsub.f32 %v900_v0, %v902_v2 }
 0x365   :  { %v904_v5 = vmul.f32 1.442695, %v903_v3  ;;  %v907_v6 = vmul.f32 1.442695, %v906_v4 }
 0x367   :  { %1356 = vpow2.f32 %v904_v5 }
 0x368   :  { %1358 = vpow2.f32 %v907_v6 }
 0x374   :  { %v1357_v7 = vpop.eup %1356 }
 0x375   :  { %v1359_v8 = vpop.eup %1358 }
 0x376   :  { %v909_v9 = vadd.f32 %v1359_v8, %v1357_v7 }
 0x378   :  { %1360 = vrcp.f32 %v909_v9 }
 0x385   :  { %v1361_v10 = vpop.eup %1360 }
 0x386   :  { %v912_v11 = vmul.f32 %v1361_v10, %v1359_v8  ;;  %v911_v12 = vmul.f32 %v1361_v10, %v1357_v7 }
 0x388   :  { %1130 = vmatprep.subr.msk.mxu0 %vm922_vm3, %v912_v11 }
 0x389   :  { %1131 = vmatpush1.msk.msra.mxu0 %vm922_vm3, %v911_v12 }
 0x38a   :  { %1132 = vmatmul.mubr.msk.f32.vlgmr.msra.gmra.mxu0 %vm915_vm4, %v913_v13 }
 0x38b   :  { %999 = vmatprep.mubr.f32.mxu0 %v1362_v1 }
 0x38e   :  { %1133 = vmatmul.mubr.msk.f32.gmra.mxu0 %vm915_vm4, %v914_v14 }
 0x44a   :  { %v995_v15 = vpop.f32.mrf.mxu0 }
 0x44b   :  { %v1006_v17 = vmul.f32 %v995_v15, %v334_v40 }
 0x44c   :  { %v997_v16 = vpop.f32.mrf.mxu0 }
 0x44d   :  { %v1008_v18 = vmul.f32 %v997_v16, %v640_v38 }
 0x44e   :  { %v1001_v19 = vpop.f32.mrf.mxu0 }
 0x44f   :  { %v1010_v20 = vadd.f32 %v1008_v18, %v1006_v17  ;;  %v1007_v1 = vmul.f32 %v1001_v19, %v335_v37 }
 0x450   :  { %v1003_v21 = vpop.f32.mrf.mxu0 }
 0x451   :  { %1012 = vst [vmem:[%s1739_s9] sm:$0xff] %v1010_v20  ;;  %v1009_v22 = vmul.f32 %v1003_v21, %v641_v39 }
 0x453   :  { %v1011_v23 = vadd.f32 %v1009_v22, %v1007_v1 }
 0x455   :  { %1013 = vst [vmem:[%s1739_s9 + $0x8] sm:$0xff] %v1011_v23 }

</bundles_post_ra>
